<compile_context>
chip_gen: v6e
topology: v6e:2x2x1
jax: 0.10.0
libtpu: 0.0.40
codegen_flags: <defaults>
</compile_context>

<pallas_src>
import functools

import jax
import jax.numpy as jnp
from jax.experimental import pallas as pl
from jax.experimental.pallas import tpu as pltpu


def _round_up(x, m):
    return (x + m - 1) // m * m


def _conv_relu_norm_kernel(x_ref, w_ref, b_ref, g_ref, beta_ref, o_ref, *,
                           TT, K, C_out, eps, fuse_taps, resident):
    """One (batch, time-tile) grid step.

    x_ref:    resident=True : (1, T_p + K - 1, C_in)  whole halo-padded batch element
              resident=False: (1, TT + K - 1, C_in)   one overlapping halo window
    w_ref:    fuse_taps=True : (K * C_in, C_out_p)    host-prereshaped, tap-major rows
              fuse_taps=False: (K, C_in, C_out_p)
    b_ref:    (1, C_out_p)   conv bias        (f32)
    g_ref:    (1, C_out_p)   LayerNorm gamma  (f32)
    beta_ref: (1, C_out_p)   LayerNorm beta   (f32)
    o_ref:    (1, TT, C_out_p)
    """
    if resident:
        # Base row of this time tile inside the halo-padded input (TT is a mult. of 8).
        base = pl.multiple_of(pl.program_id(1) * TT, 8)
    else:
        base = 0

    # ---- Conv1d on the MXU (low-precision operands, f32 accumulation) ----
    # Taps 1..K-1 start at sublane-misaligned rows; on a mem-bound kernel the per-vreg
    # sublane shifts are noise here (see review item on pltpu.roll if that changes).
    if fuse_taps:
        # im2col along the lane axis: one matmul with contraction K*C_in instead of
        # K tiny matmuls + (K-1) full-size VPU adds. Only used when C_in % 128 == 0,
        # so the concat is layout-trivial. Weight reshape was hoisted to the host.
        xc = jnp.concatenate(
            [x_ref[0, pl.ds(base + tap, TT), :] for tap in range(K)], axis=-1)
        acc = jnp.dot(xc, w_ref[...], preferred_element_type=jnp.float32)
    else:
        acc = jnp.dot(x_ref[0, pl.ds(base, TT), :], w_ref[0],
                      preferred_element_type=jnp.float32)
        for tap in range(1, K):  # K is a small static int -> unrolled
            acc += jnp.dot(x_ref[0, pl.ds(base + tap, TT), :], w_ref[tap],
                           preferred_element_type=jnp.float32)
        # TODO(synk): on v7x, check the bundle dump that this K-dot chain accumulates
        # in the MRB; if each tap pops and adds on the VPU, drive the MXU explicitly
        # (pltpu.matmul_push_rhs / matmul_acc_lhs / matmul_pop).

    acc += b_ref[0]

    # ---- ReLU ----
    acc = jnp.maximum(acc, 0.0)

    # ---- LayerNorm over the real C_out channels (f32 statistics) ----
    # Padded output channels are exactly zero through zero weights/bias + ReLU, so the
    # raw lane sums of x and x^2 are already correct (no mask). E[x^2] - mean^2 keeps
    # the two lane reductions independent; clamp guards f32 cancellation.
    inv_c = 1.0 / C_out
    s1 = jnp.sum(acc, axis=-1, keepdims=True)
    s2 = jnp.sum(acc * acc, axis=-1, keepdims=True)
    mean = s1 * inv_c
    var = jnp.maximum(s2 * inv_c - mean * mean, 0.0)
    out = (acc - mean) * jax.lax.rsqrt(var + eps) * g_ref[0] + beta_ref[0]

    # Dropout(p=0.0) is the identity in the FastPitch default / eval path.
    o_ref[0] = out.astype(o_ref.dtype)


def conv_relu_norm_ntc(x_ntc, weight, bias, gamma, beta, *, eps=1e-5,
                       compute_dtype=jnp.bfloat16, out_dtype=None,
                       time_tile=512, resident_input_bytes=8 * 1024 * 1024):
    """Core op in NTC layout. x_ntc: (B, T, C_in) -> (B, T, C_out).

    Stacked ConvReLUNorm layers (FastPitch predictors) should call this directly
    (bf16 activations, NTC) to avoid per-layer transpose/cast HBM round trips.
    """
    B, T, C_in = x_ntc.shape
    C_out, C_in_w, K = weight.shape
    assert C_in_w == C_in
    # padding=K//2 reproduces the PyTorch output length only for odd kernel_size.
    assert K % 2 == 1, "ConvReLUNorm kernel requires odd kernel_size"
    pad = K // 2
    out_dtype = x_ntc.dtype if out_dtype is None else out_dtype

    # ---- Static tiling decisions -------------------------------------------
    # Output channel padding: unmasked lane-dense stores are a win, but not when the
    # padding would >=2x the write traffic (e.g. C_out=32 -> 128) on a mem-bound op.
    c128 = _round_up(C_out, 128)
    C_out_p = C_out if (C_out % 128 == 0 or c128 >= 2 * C_out) else c128

    # Time tile: 512 rows by default (multiple of 8), adaptive for short inputs.
    TT = min(_round_up(int(time_tile), 8), _round_up(T, 8))
    T_p = _round_up(T, TT)
    n_tt = T_p // TT
    win = TT + K - 1

    # Fuse the K taps into one matmul only when C_in is already lane-aligned (the
    # in-kernel concat is then layout-trivial) and the contraction stays small.
    # C_in is never padded in HBM (avoids up to 8x input-read inflation).
    fuse_taps = (K > 1) and (C_in % 128 == 0) and (K * C_in <= 512)

    # ---- Host-side layout: halo + time-tile padding (no channel padding) -----
    x_c = x_ntc.astype(compute_dtype)
    x_halo = jnp.pad(x_c, ((0, 0), (pad, pad + (T_p - T)), (0, 0)))
    T_halo = x_halo.shape[1]                              # T_p + K - 1
    in_itemsize = jnp.dtype(compute_dtype).itemsize

    # Input VMEM strategy: resident batch element (zero extra copies) while small,
    # otherwise overlapping halo windows so per-step input VMEM is O(TT).
    resident = (2 * T_halo * C_in * in_itemsize) <= int(resident_input_bytes)
    if resident:
        x_in = x_halo
        x_spec = pl.BlockSpec((1, T_halo, C_in), lambda b, t: (b, 0, 0))
        in_block_rows = T_halo
    else:
        x_in = jnp.stack(
            [x_halo[:, i * TT:i * TT + win, :] for i in range(n_tt)], axis=1
        ).reshape(B * n_tt, win, C_in)
        x_spec = pl.BlockSpec((1, win, C_in), lambda b, t, n=n_tt: (b * n + t, 0, 0))
        in_block_rows = win

    # Conv1d weight (C_out, C_in, K) -> tap-major (K, C_in, C_out_p); reshape for the
    # fused path is hoisted to the host.
    w_kio = jnp.transpose(weight, (2, 1, 0)).astype(compute_dtype)
    if C_out_p != C_out:
        w_kio = jnp.pad(w_kio, ((0, 0), (0, 0), (0, C_out_p - C_out)))
    if fuse_taps:
        w_in = w_kio.reshape(K * C_in, C_out_p)
        w_spec = pl.BlockSpec((K * C_in, C_out_p), lambda b, t: (0, 0))
    else:
        w_in = w_kio
        w_spec = pl.BlockSpec((K, C_in, C_out_p), lambda b, t: (0, 0, 0))

    b2 = jnp.pad(bias, (0, C_out_p - C_out)).astype(jnp.float32).reshape(1, C_out_p)
    g2 = jnp.pad(gamma, (0, C_out_p - C_out)).astype(jnp.float32).reshape(1, C_out_p)
    be2 = jnp.pad(beta, (0, C_out_p - C_out)).astype(jnp.float32).reshape(1, C_out_p)

    # VMEM limit from actual block sizes (double-buffered in/out + weights + f32
    # temporaries), capped at 48 MiB to leave headroom under v7x's 64 MiB VMEM.
    out_itemsize = jnp.dtype(out_dtype).itemsize
    need = (2 * in_block_rows * C_in * in_itemsize
            + 2 * TT * C_out_p * out_itemsize
            + K * C_in * C_out_p * in_itemsize
            + 4 * TT * C_out_p * 4
            + 6 * C_out_p * 4)
    vmem_limit = int(min(max(2 * need, 16 * 1024 * 1024), 48 * 1024 * 1024))

    kernel = functools.partial(_conv_relu_norm_kernel, TT=TT, K=K, C_out=C_out,
                               eps=eps, fuse_taps=fuse_taps, resident=resident)

    out_ntc = pl.pallas_call(
        kernel,
        out_shape=jax.ShapeDtypeStruct((B, T_p, C_out_p), out_dtype),
        grid_spec=pltpu.PrefetchScalarGridSpec(
            num_scalar_prefetch=0,
            grid=(B, n_tt),
            in_specs=[
                x_spec,
                w_spec,
                pl.BlockSpec((1, C_out_p), lambda b, t: (0, 0)),
                pl.BlockSpec((1, C_out_p), lambda b, t: (0, 0)),
                pl.BlockSpec((1, C_out_p), lambda b, t: (0, 0)),
            ],
            out_specs=pl.BlockSpec((1, TT, C_out_p), lambda b, t: (b, t, 0)),
        ),
        compiler_params=pltpu.CompilerParams(
            # Both axes are independent; with time-tiled input blocks, sharding t
            # across TensorCores no longer duplicates the input HBM read.
            # TODO(synk): on v7x, consider pltpu.CORE_PARALLEL on the batch axis when
            # B >= num_cores for deliberate core sharding.
            dimension_semantics=("parallel", "parallel"),
            vmem_limit_bytes=vmem_limit,
        ),
    )(x_in, w_in, b2, g2, be2)

    out_ntc = out_ntc[:, :T, :]
    if C_out_p != C_out:
        out_ntc = out_ntc[:, :, :C_out]
    return out_ntc


def conv_relu_norm(signal, weight, bias, gamma, beta, *, eps=1e-5,
                   compute_dtype=jnp.bfloat16, out_dtype=None, time_tile=512,
                   resident_input_bytes=8 * 1024 * 1024):
    """signal: (B, C_in, T) NCT like PyTorch Conv1d. Returns (B, C_out, T) NCT."""
    # TODO(synk): when ConvReLUNorm layers are stacked, keep activations in NTC/bf16
    # end-to-end via conv_relu_norm_ntc and drop these transposes — each is an extra
    # HBM round trip of the activation per layer on a memory-bound op.
    x_ntc = jnp.transpose(signal, (0, 2, 1))
    out_ntc = conv_relu_norm_ntc(
        x_ntc, weight, bias, gamma, beta, eps=eps, compute_dtype=compute_dtype,
        out_dtype=signal.dtype if out_dtype is None else out_dtype,
        time_tile=time_tile, resident_input_bytes=resident_input_bytes)
    return jnp.transpose(out_ntc, (0, 2, 1))


def _reference(signal, weight, bias, gamma, beta, eps=1e-5):
    """Pure-JAX f32 reference matching PyTorch semantics."""
    B, C_in, T = signal.shape
    C_out, _, K = weight.shape
    pad = K // 2
    x = jnp.transpose(signal, (0, 2, 1))
    x = jnp.pad(x, ((0, 0), (pad, pad), (0, 0)))
    w = jnp.transpose(weight, (2, 1, 0))
    acc = jnp.zeros((B, T, C_out), jnp.float32)
    for tap in range(K):
        acc = acc + jnp.einsum("bti,io->bto", x[:, tap:tap + T, :], w[tap],
                               precision=jax.lax.Precision.HIGHEST)
    acc = acc + bias[None, None, :]
    acc = jnp.maximum(acc, 0.0)
    mean = jnp.mean(acc, axis=-1, keepdims=True)
    var = jnp.mean((acc - mean) ** 2, axis=-1, keepdims=True)
    out = (acc - mean) * jax.lax.rsqrt(var + eps) * gamma + beta
    return jnp.transpose(out, (0, 2, 1))


def _make_inputs(key, B, C_in, C_out, T, K):
    k_sig, k_w, k_b, k_g, k_beta = jax.random.split(key, 5)
    signal = jax.random.normal(k_sig, (B, C_in, T), jnp.float32)
    weight = jax.random.normal(k_w, (C_out, C_in, K), jnp.float32) * 0.1
    bias = jax.random.normal(k_b, (C_out,), jnp.float32) * 0.1
    gamma = 1.0 + 0.1 * jax.random.normal(k_g, (C_out,), jnp.float32)
    beta = 0.1 * jax.random.normal(k_beta, (C_out,), jnp.float32)
    return signal, weight, bias, gamma, beta


if __name__ == "__main__":
    key = jax.random.PRNGKey(0)
    k1, k2, k3 = jax.random.split(key, 3)

    # --- Config 1: small C_in/C_out (unpadded C_out path, non-fused taps) ---------
    B, C_in, C_out, T, K = 2, 16, 32, 27, 3   # T=27 exercises time-tile padding
    sig, w, b, g, be = _make_inputs(k1, B, C_in, C_out, T, K)
    ref = _reference(sig, w, b, g, be)

    out_f32 = jax.block_until_ready(
        conv_relu_norm(sig, w, b, g, be, compute_dtype=jnp.float32))
    assert out_f32.shape == (B, C_out, T)
    assert jnp.allclose(out_f32, ref, atol=5e-3, rtol=5e-3), "cfg1 f32 mismatch"

    out_bf16 = jax.block_until_ready(conv_relu_norm(sig, w, b, g, be))
    assert out_bf16.shape == (B, C_out, T)
    assert jnp.allclose(out_bf16, ref, atol=5e-2, rtol=5e-2), "cfg1 bf16 mismatch"

    # --- Config 2: lane-aligned C_in (fused-tap path) + padded C_out --------------
    B2, C_in2, C_out2, T2, K2 = 1, 128, 80, 40, 3
    sig2, w2, b2_, g2_, be2_ = _make_inputs(k2, B2, C_in2, C_out2, T2, K2)
    ref2 = _reference(sig2, w2, b2_, g2_, be2_)
    out2 = jax.block_until_ready(
        conv_relu_norm(sig2, w2, b2_, g2_, be2_, compute_dtype=jnp.float32))
    assert out2.shape == (B2, C_out2, T2)
    assert jnp.allclose(out2, ref2, atol=5e-3, rtol=5e-3), "cfg2 mismatch"

    # --- Config 3: force the overlapping-halo-window (long-T / v7x) input path ----
    B3, C_in3, C_out3, T3, K3 = 2, 16, 32, 100, 3
    sig3, w3, b3, g3, be3 = _make_inputs(k3, B3, C_in3, C_out3, T3, K3)
    ref3 = _reference(sig3, w3, b3, g3, be3)
    out3 = jax.block_until_ready(
        conv_relu_norm(sig3, w3, b3, g3, be3, compute_dtype=jnp.float32,
                       time_tile=32, resident_input_bytes=0))
    assert out3.shape == (B3, C_out3, T3)
    assert jnp.allclose(out3, ref3, atol=5e-3, rtol=5e-3), "cfg3 (windowed) mismatch"

    print("KERNEL_OK")
</pallas_src>

<mosaic_0001>
module attributes {stable_mosaic.version = 11 : i64} {
  func.func @_conv_relu_norm_kernel(%arg0: i32, %arg1: i32, %arg2: memref<1x34x16xf32, #tpu.memory_space<vmem>>, %arg3: memref<3x16x32xf32, #tpu.memory_space<vmem>>, %arg4: memref<1x32xf32, #tpu.memory_space<vmem>>, %arg5: memref<1x32xf32, #tpu.memory_space<vmem>>, %arg6: memref<1x32xf32, #tpu.memory_space<vmem>>, %arg7: memref<1x32x32xf32, #tpu.memory_space<vmem>>) attributes {dimension_semantics = [#tpu.dimension_semantics<parallel>, #tpu.dimension_semantics<parallel>], iteration_bounds = array<i64: 2, 1>, scalar_prefetch = 0 : i64, scratch_operands = 0 : i64, tpu.core_type = #tpu.core_type<tc>, window_params = [{transform_indices = @transform_0, window_bounds = array<i64: 1, 34, 16>}, {pipeline_mode = #tpu.pipeline_mode<synchronous>, transform_indices = @transform_1, window_bounds = array<i64: 3, 16, 32>}, {pipeline_mode = #tpu.pipeline_mode<synchronous>, transform_indices = @transform_2, window_bounds = array<i64: 1, 32>}, {pipeline_mode = #tpu.pipeline_mode<synchronous>, transform_indices = @transform_3, window_bounds = array<i64: 1, 32>}, {pipeline_mode = #tpu.pipeline_mode<synchronous>, transform_indices = @transform_4, window_bounds = array<i64: 1, 32>}, {transform_indices = @transform_5, window_bounds = array<i64: 1, 32, 32>}]} {
    %c32_i32 = arith.constant 32 : i32
    %0 = arith.muli %arg1, %c32_i32 : i32
    %1 = tpu.assume_multiple %0, 8 : i32
    %c0 = arith.constant 0 : index
    %2 = arith.index_cast %1 : i32 to index
    %c0_0 = arith.constant 0 : index
    %3 = vector.load %arg2[%c0, %2, %c0_0] : memref<1x34x16xf32, #tpu.memory_space<vmem>>, vector<1x32x16xf32>
    %4 = vector.shape_cast %3 : vector<1x32x16xf32> to vector<32x16xf32>
    %c0_1 = arith.constant 0 : index
    %c0_2 = arith.constant 0 : index
    %c0_3 = arith.constant 0 : index
    %5 = vector.load %arg3[%c0_1, %c0_2, %c0_3] : memref<3x16x32xf32, #tpu.memory_space<vmem>>, vector<1x16x32xf32>
    %6 = vector.shape_cast %5 : vector<1x16x32xf32> to vector<16x32xf32>
    %cst = arith.constant dense<0.000000e+00> : vector<32x32xf32>
    %7 = tpu.matmul %4, %6, %cst {dimension_numbers = #tpu.dot_dimension_numbers<[1], [0], [0], [1], [0, 0, 1, 1], [], []>} : vector<32x16xf32>, vector<16x32xf32>, vector<32x32xf32> -> vector<32x32xf32>
    %c1_i32 = arith.constant 1 : i32
    %8 = arith.addi %1, %c1_i32 : i32
    %c0_4 = arith.constant 0 : index
    %9 = arith.index_cast %8 : i32 to index
    %c0_5 = arith.constant 0 : index
    %10 = vector.load %arg2[%c0_4, %9, %c0_5] : memref<1x34x16xf32, #tpu.memory_space<vmem>>, vector<1x32x16xf32>
    %11 = vector.shape_cast %10 : vector<1x32x16xf32> to vector<32x16xf32>
    %c1 = arith.constant 1 : index
    %c0_6 = arith.constant 0 : index
    %c0_7 = arith.constant 0 : index
    %12 = vector.load %arg3[%c1, %c0_6, %c0_7] : memref<3x16x32xf32, #tpu.memory_space<vmem>>, vector<1x16x32xf32>
    %13 = vector.shape_cast %12 : vector<1x16x32xf32> to vector<16x32xf32>
    %cst_8 = arith.constant dense<0.000000e+00> : vector<32x32xf32>
    %14 = tpu.matmul %11, %13, %cst_8 {dimension_numbers = #tpu.dot_dimension_numbers<[1], [0], [0], [1], [0, 0, 1, 1], [], []>} : vector<32x16xf32>, vector<16x32xf32>, vector<32x32xf32> -> vector<32x32xf32>
    %15 = arith.addf %7, %14 : vector<32x32xf32>
    %c2_i32 = arith.constant 2 : i32
    %16 = arith.addi %1, %c2_i32 : i32
    %c0_9 = arith.constant 0 : index
    %17 = arith.index_cast %16 : i32 to index
    %c0_10 = arith.constant 0 : index
    %18 = vector.load %arg2[%c0_9, %17, %c0_10] : memref<1x34x16xf32, #tpu.memory_space<vmem>>, vector<1x32x16xf32>
    %19 = vector.shape_cast %18 : vector<1x32x16xf32> to vector<32x16xf32>
    %c2 = arith.constant 2 : index
    %c0_11 = arith.constant 0 : index
    %c0_12 = arith.constant 0 : index
    %20 = vector.load %arg3[%c2, %c0_11, %c0_12] : memref<3x16x32xf32, #tpu.memory_space<vmem>>, vector<1x16x32xf32>
    %21 = vector.shape_cast %20 : vector<1x16x32xf32> to vector<16x32xf32>
    %cst_13 = arith.constant dense<0.000000e+00> : vector<32x32xf32>
    %22 = tpu.matmul %19, %21, %cst_13 {dimension_numbers = #tpu.dot_dimension_numbers<[1], [0], [0], [1], [0, 0, 1, 1], [], []>} : vector<32x16xf32>, vector<16x32xf32>, vector<32x32xf32> -> vector<32x32xf32>
    %23 = arith.addf %15, %22 : vector<32x32xf32>
    %c0_14 = arith.constant 0 : index
    %c0_15 = arith.constant 0 : index
    %24 = vector.load %arg4[%c0_14, %c0_15] : memref<1x32xf32, #tpu.memory_space<vmem>>, vector<1x32xf32>
    %25 = vector.shape_cast %24 : vector<1x32xf32> to vector<32xf32>
    %26 = vector.shape_cast %25 : vector<32xf32> to vector<1x32xf32>
    %27 = vector.broadcast %26 : vector<1x32xf32> to vector<32x32xf32>
    %28 = arith.addf %23, %27 : vector<32x32xf32>
    %cst_16 = arith.constant 0.000000e+00 : f32
    %29 = vector.broadcast %cst_16 : f32 to vector<32x32xf32>
    %30 = arith.maximumf %28, %29 : vector<32x32xf32>
    %cst_17 = arith.constant dense<0.000000e+00> : vector<32xf32>
    %31 = vector.multi_reduction <add>, %30, %cst_17 [1] : vector<32x32xf32> to vector<32xf32>
    %32 = vector.shape_cast %31 : vector<32xf32> to vector<32x1xf32>
    %33 = arith.mulf %30, %30 : vector<32x32xf32>
    %cst_18 = arith.constant dense<0.000000e+00> : vector<32xf32>
    %34 = vector.multi_reduction <add>, %33, %cst_18 [1] : vector<32x32xf32> to vector<32xf32>
    %35 = vector.shape_cast %34 : vector<32xf32> to vector<32x1xf32>
    %cst_19 = arith.constant 3.125000e-02 : f32
    %36 = vector.broadcast %cst_19 : f32 to vector<32x1xf32>
    %37 = arith.mulf %32, %36 : vector<32x1xf32>
    %cst_20 = arith.constant 3.125000e-02 : f32
    %38 = vector.broadcast %cst_20 : f32 to vector<32x1xf32>
    %39 = arith.mulf %35, %38 : vector<32x1xf32>
    %40 = arith.mulf %37, %37 : vector<32x1xf32>
    %41 = arith.subf %39, %40 : vector<32x1xf32>
    %cst_21 = arith.constant 0.000000e+00 : f32
    %42 = vector.broadcast %cst_21 : f32 to vector<32x1xf32>
    %43 = arith.maximumf %41, %42 : vector<32x1xf32>
    %44 = vector.broadcast %37 : vector<32x1xf32> to vector<32x32xf32>
    %45 = arith.subf %30, %44 : vector<32x32xf32>
    %cst_22 = arith.constant 9.99999974E-6 : f32
    %46 = vector.broadcast %cst_22 : f32 to vector<32x1xf32>
    %47 = arith.addf %43, %46 : vector<32x1xf32>
    %48 = math.rsqrt %47 : vector<32x1xf32>
    %49 = vector.broadcast %48 : vector<32x1xf32> to vector<32x32xf32>
    %50 = arith.mulf %45, %49 : vector<32x32xf32>
    %c0_23 = arith.constant 0 : index
    %c0_24 = arith.constant 0 : index
    %51 = vector.load %arg5[%c0_23, %c0_24] : memref<1x32xf32, #tpu.memory_space<vmem>>, vector<1x32xf32>
    %52 = vector.shape_cast %51 : vector<1x32xf32> to vector<32xf32>
    %53 = vector.shape_cast %52 : vector<32xf32> to vector<1x32xf32>
    %54 = vector.broadcast %53 : vector<1x32xf32> to vector<32x32xf32>
    %55 = arith.mulf %50, %54 : vector<32x32xf32>
    %c0_25 = arith.constant 0 : index
    %c0_26 = arith.constant 0 : index
    %56 = vector.load %arg6[%c0_25, %c0_26] : memref<1x32xf32, #tpu.memory_space<vmem>>, vector<1x32xf32>
    %57 = vector.shape_cast %56 : vector<1x32xf32> to vector<32xf32>
    %58 = vector.shape_cast %57 : vector<32xf32> to vector<1x32xf32>
    %59 = vector.broadcast %58 : vector<1x32xf32> to vector<32x32xf32>
    %60 = arith.addf %55, %59 : vector<32x32xf32>
    %c0_27 = arith.constant 0 : index
    %c0_28 = arith.constant 0 : index
    %c0_29 = arith.constant 0 : index
    %61 = vector.load %arg7[%c0_27, %c0_28, %c0_29] : memref<1x32x32xf32, #tpu.memory_space<vmem>>, vector<1x32x32xf32>
    %62 = vector.shape_cast %61 : vector<1x32x32xf32> to vector<32x32xf32>
    %63 = vector.shape_cast %60 : vector<32x32xf32> to vector<1x32x32xf32>
    tpu.vector_store %arg7[%c0_27, %c0_28, %c0_29], %63 {strides = array<i32>} : memref<1x32x32xf32, #tpu.memory_space<vmem>>, vector<1x32x32xf32>,
    return
  }
  func.func @transform_0(%arg0: i32, %arg1: i32) -> (i32, i32, i32) {
    %c0_i32 = arith.constant 0 : i32
    %c0_i32_0 = arith.constant 0 : i32
    %c0_i32_1 = arith.constant 0 : i32
    return %arg0, %c0_i32, %c0_i32_0 : i32, i32, i32
  }
  func.func @transform_1(%arg0: i32, %arg1: i32) -> (i32, i32, i32) {
    %c0_i32 = arith.constant 0 : i32
    %c0_i32_0 = arith.constant 0 : i32
    %c0_i32_1 = arith.constant 0 : i32
    %c0_i32_2 = arith.constant 0 : i32
    return %c0_i32, %c0_i32_0, %c0_i32_1 : i32, i32, i32
  }
  func.func @transform_2(%arg0: i32, %arg1: i32) -> (i32, i32) {
    %c0_i32 = arith.constant 0 : i32
    %c0_i32_0 = arith.constant 0 : i32
    %c0_i32_1 = arith.constant 0 : i32
    return %c0_i32, %c0_i32_0 : i32, i32
  }
  func.func @transform_3(%arg0: i32, %arg1: i32) -> (i32, i32) {
    %c0_i32 = arith.constant 0 : i32
    %c0_i32_0 = arith.constant 0 : i32
    %c0_i32_1 = arith.constant 0 : i32
    return %c0_i32, %c0_i32_0 : i32, i32
  }
  func.func @transform_4(%arg0: i32, %arg1: i32) -> (i32, i32) {
    %c0_i32 = arith.constant 0 : i32
    %c0_i32_0 = arith.constant 0 : i32
    %c0_i32_1 = arith.constant 0 : i32
    return %c0_i32, %c0_i32_0 : i32, i32
  }
  func.func @transform_5(%arg0: i32, %arg1: i32) -> (i32, i32, i32) {
    %c0_i32 = arith.constant 0 : i32
    %c0_i32_0 = arith.constant 0 : i32
    return %arg0, %arg1, %c0_i32 : i32, i32, i32
  }
}

</mosaic_0001>

<bundles_post_ra>
// kernel: tpu_custom_call.1
= control target key start
LH: loop header
LB: loop body
LE: loop exit
PB: predicated region body
PF: predicated region fallthrough
CT: control target
= control target key end

     0   :  { %10 = vsyncpa [#allocation3], 0  ;;  %s1225_s0 = inlined_call_operand.vmem [shape: f32[2,34,16], index: 0, kind: input, shape index: {}]   ;;  %s1226_s1 = inlined_call_operand.vmem [shape: f32[3,16,32], index: 1, kind: input, shape index: {}]   ;;  %s1227_s2 = inlined_call_operand.vmem [shape: f32[1,32], index: 2, kind: input, shape index: {}]   ;;  %s1228_s3 = inlined_call_operand.vmem [shape: f32[1,32], index: 3, kind: input, shape index: {}]   ;;  %s1229_s4 = inlined_call_operand.vmem [shape: f32[1,32], index: 4, kind: input, shape index: {}]   ;;  %s1230_s5 = inlined_call_operand.hbm [shape: f32[2,32,32], index: 5, kind: output, shape index: {}]  }
   0x1   :  { %12 = vsyncpa [#allocation3 + $0x1], 0  ;;  %s1032_s18 = smov 0   ;;  %s1034_s19 = smov 0  }
   0x2   :  { %s1036_s20 = smov 0   ;;  %s1038_s21 = smov 0  }
   0x3   :  { %s1040_s22 = smov 0   ;;  %s1042_s23 = smov 0  }
   0x4 LB: > { %s763_s24 = sadd.s32 4294967295, %s997_s23   ;;  %s764_s25 = sadd.s32 4294967294, %s997_s23   ;;  %s997_s23 = sphi %s1042_s23, %s18_s23   ;;  %s993_s22 = sphi %s1040_s22, %s1237_s22   ;;  %s989_s21 = sphi %s1038_s21, %s1236_s21   ;;  %s985_s20 = sphi %s1036_s20, %s1235_s20   ;;  %s981_s19 = sphi %s1034_s19, %s1234_s19   ;;  %s977_s18 = sphi %s1032_s18, %s1233_s18  }
   0x5   : > { %s30_s26 = sadd.s32 1, %s993_s22  ;;  %s149_s27 = sadd.s32 1, %s985_s20 }
   0x6   : > { %p32_p0 = scmp.ge.s32.totalorder %s30_s26, 2  ;;  %p159_p1 = scmp.ne.s32.totalorder %s985_s20, %s981_s19 }
   0x7   : > { %p160_p2 = scmp.eq.s32.totalorder %s763_s24, 1  ;;  %p165_p3 = scmp.ne.s32.totalorder %s981_s19, %s977_s18 }
   0x8   : > { %s1239_s26 = smov (%p32_p0, %s30_s26), 0  ;;  %p166_p5 = scmp.eq.s32.totalorder %s764_s25, 1 }
   0x9   : > { %p1072_p4 = por %p160_p2, %p159_p1  ;;  %s144_s29 = ssub.s32 %s993_s22, %s1239_s26 }
   0xa   : > { %p767_p6 = scmp.ge.s32.totalorder %s997_s23, 1  ;;  %p147_p7 = scmp.eq.s32.totalorder %s144_s29, 0 }
   0xb   : > { %p1079_p8 = por %p166_p5, %p165_p3  ;;  %p204_p9 = scmp.lt.s32.totalorder %s997_s23, 3 }
   0xc   : > { %s1085_s6 = scalar_select %p147_p7, %s985_s20, %s149_s27  }
   0xd   : > { %p205_p10 = pnand %p767_p6, %p204_p9 }
   0xe   : > { %p232_p11 = scmp.lt.s32.totalorder (!%p205_p10), %s989_s21, 1  ;;  %s802_s24 = sshll.u32 (!%p205_p10), %s989_s21, 9 }
   0xf   : > { %208 = sbr.rel (%p205_p10) target bundleno = 429 (0x1ad), region = 40  ;;  %s1172_s7 = scalar_lea.hbm (!%p205_p10), %s1230_s5, %s802_s24 }
  0x10   : > { %s999_s9 = smov (!%p205_p10), [#allocation2]  }
  0x11   : > { %s925_s10 = sshll.u32 (!%p205_p10), %s999_s9, 4  ;;  %s926_s10 = int_to_ptr.vmem [resolvable:$false] %s925_s10 }
  0x12   : > { %s927_s12 = scalar_lea.vmem (!%p205_p10), %s926_s10, 1024 }
  0x14   : > { %v775_v0 = vld [vmem:[%s1226_s1 + $0x18] sm:$0xff]  ;;  %v774_v1 = vld [vmem:[%s1226_s1 + $0x10] sm:$0xff]  ;;  %s233_s11 = scalar_select %p232_p11, %s989_s21, 1  ;;  %v245_v2 = vld [vmem:[%s1226_s1 + $0x8] sm:$0xff]  ;;  %vm255_vm0 = vcmask 130048   ;;  %vm575_vm1 = vcmask 261120  }
  0x15   : > { %851 = vmatprep.subr.mxu1 %v775_v0  ;;  %821 = vmatprep.subr.mxu0 %v775_v0  ;;  %v789_v3 = vld [vmem:[%s1226_s1 + $0x28] sm:$0xff]  ;;  %v244_v8 = vld [vmem:[%s1226_s1] sm:$0xff] }
  0x16   : > { %853 = vmatpush3.msra.mxu1 %v775_v0  ;;  %822 = vmatpush3.msra.mxu0 %v775_v0  ;;  %s855_s16 = smul.u32 40, %s233_s11  ;;  %v788_v9 = vld [vmem:[%s1226_s1 + $0x20] sm:$0xff]  ;;  %s229_s11 = sand.u32 1, %s981_s19  }
  0x17   : > { %852 = vmatprep.subr.mxu1 %v774_v1  ;;  %823 = vmatprep.subr.mxu0 %v774_v1  ;;  %v794_v25 = vld [vmem:[%s1227_s2] ss:$0 sm:$0xff]  ;;  %s768_s14 = sshll.u32 %s229_s11, 5  ;;  %s1180_s21 = scalar_lea.sflag [#allocation3], %s229_s11 }
  0x18   : > { %854 = vmatpush3.msra.mxu1 %v774_v1  ;;  %824 = vmatpush3.msra.mxu0 %v774_v1  ;;  %s236_s25 = scalar_lea.vmem %s1225_s0, %s855_s16  ;;  %s231_s17 = scalar_lea.vmem [#allocation2], %s768_s14 }
  0x19   : > { %831 = vmatprep.subr.mxu1 %v245_v2  ;;  %841 = vmatprep.subr.mxu0 %v789_v3  ;;  %v770_v4 = vld [vmem:[%s236_s25 + $0x1] sm:$0xff]  ;;  %v772_v5 = vld [vmem:[%s236_s25 + $0x11] sm:$0xff]  ;;  %v771_v6 = vld [vmem:[%s236_s25 + $0x9] sm:$0xff] }
  0x1a   : > { %825 = vmatprep.mubr.msk.f32.mxu0 %vm255_vm0, %v770_v4  ;;  %828 = vmatprep.mubr.msk.f32.mxu1 %vm255_vm0, %v772_v5  ;;  %v773_v7 = vld [vmem:[%s236_s25 + $0x19] sm:$0xff]  ;;  %v784_v11 = vld [vmem:[%s236_s25 + $0x2] sm:$0xff]  ;;  %v785_v13 = vld [vmem:[%s236_s25 + $0xa] sm:$0xff] }
  0x1b   : > { %826 = vmatmul.mubr.msk.f32.vlgmr.msra.gmra.mxu0 %vm255_vm0, %v771_v6  ;;  %829 = vmatmul.mubr.msk.f32.vlgmr.msra.gmra.mxu1 %vm255_vm0, %v773_v7  ;;  %v240_v10 = vld [vmem:[%s236_s25] sm:$0xff]  ;;  %v241_v12 = vld [vmem:[%s236_s25 + $0x8] sm:$0xff]  ;;  %v242_v14 = vld [vmem:[%s236_s25 + $0x10] sm:$0xff] }
  0x1c   : > { %832 = vmatpush3.msra.mxu1 %v245_v2  ;;  %842 = vmatpush3.msra.mxu0 %v789_v3  ;;  %v786_v15 = vld [vmem:[%s236_s25 + $0x12] sm:$0xff]  ;;  %v787_v17 = vld [vmem:[%s236_s25 + $0x1a] sm:$0xff] }
  0x1d   : > { %833 = vmatprep.subr.mxu1 %v244_v8  ;;  %843 = vmatprep.subr.mxu0 %v788_v9  ;;  %v243_v16 = vld [vmem:[%s236_s25 + $0x18] sm:$0xff]  ;;  %s682_s25 = sshll.u32 %s231_s17, 4  ;;  %s1174_s25 = int_to_ptr.vmem [resolvable:$true] %s682_s25 }
  0x1e   : > { %834 = vmatpush3.msra.mxu1 %v244_v8  ;;  %835 = vmatprep.mubr.msk.f32.mxu1 %vm255_vm0, %v240_v10  ;;  %s921_s8 = scalar_lea.vmem %s1174_s25, 512  ;;  %p928_p1 = scmp.lt.s32.totalorder %s1174_s25, %s926_s10 }
  0x1f   : > { %844 = vmatpush3.msra.mxu0 %v788_v9  ;;  %845 = vmatprep.mubr.msk.f32.mxu0 %vm255_vm0, %v784_v11  ;;  %p922_p12 = scmp.ne.s32.totalorder %s1174_s25, %s921_s8  ;;  %p929_p2 = scmp.lt.s32.totalorder %s927_s12, %s921_s8 }
  0x20   : > { %836 = vmatmul.mubr.msk.f32.vlgmr.msra.gmra.mxu1 %vm255_vm0, %v241_v12  ;;  %846 = vmatmul.mubr.msk.f32.vlgmr.msra.gmra.mxu0 %vm255_vm0, %v785_v13 }
  0x21   : > { %838 = vmatprep.mubr.msk.f32.mxu1 %vm255_vm0, %v242_v14  ;;  %848 = vmatprep.mubr.msk.f32.mxu0 %vm255_vm0, %v786_v15  ;;  %p923_p13 = pnand %p922_p12, %p1072_p4  ;;  %p930_p3 = por %p929_p2, %p928_p1 }
  0x23   : > { %p924_p0 = pneg %p923_p13 }
  0x24   : > { %839 = vmatmul.mubr.msk.f32.gmra.mxu1 %vm255_vm0, %v243_v16  ;;  %849 = vmatmul.mubr.msk.f32.gmra.mxu0 %vm255_vm0, %v787_v17 }
  0x25   : > { %p931_p5 = pnand %p930_p3, %p924_p0 }
  0xdb   : > { %v827_v18 = vpop.f32.mrf.mxu0  ;;  %v830_v19 = vpop.f32.mrf.mxu1 }
  0xdd   : > { %v334_v20 = vpop.f32.mrf.mxu0  ;;  %v344_v21 = vpop.f32.mrf.mxu1 }
  0xe0   : > { %v837_v22 = vpop.f32.mrf.mxu1  ;;  %v847_v23 = vpop.f32.mrf.mxu0 }
  0xe1   : > { %v437_v24 = vadd.f32 %v837_v22, %v827_v18 }
  0xe2   : > { %v431_v26 = vpop.f32.mrf.mxu1  ;;  %v537_v27 = vpop.f32.mrf.mxu0 }
  0xe3   : > { %v557_v28 = vadd.f32 %v847_v23, %v437_v24  ;;  %v432_v29 = vadd.f32 %v431_v26, %v334_v20 }
  0xe4   : > { %v840_v30 = vpop.f32.mrf.mxu1  ;;  %v850_v31 = vpop.f32.mrf.mxu0 }
  0xe5   : > { %v568_v32 = vadd.f32 %v794_v25, %v557_v28  ;;  %v556_v33 = vadd.f32 %v537_v27, %v432_v29  ;;  %v447_v34 = vadd.f32 %v840_v30, %v830_v19  ;;  %v795_v29 = vld [vmem:[%s1228_s3] ss:$0 sm:$0xff] }
  0xe6   : > { %v441_v35 = vpop.f32.mrf.mxu1  ;;  %v547_v36 = vpop.f32.mrf.mxu0 }
  0xe7   : > { %v1125_v37 = vmax.f32 %v568_v32, 0.0  ;;  %v567_v38 = vadd.f32 %v794_v25, %v556_v33  ;;  %v442_v39 = vadd.f32 %v441_v35, %v344_v21  ;;  %v559_v40 = vadd.f32 %v850_v31, %v447_v34  ;;  %v796_v31 = vld [vmem:[%s1229_s4] ss:$0 sm:$0xff] }
  0xe9   : > { %v1127_v41 = vmax.f32 %v567_v38, 0.0  ;;  %v570_v42 = vadd.f32 %v794_v25, %v559_v40  ;;  %v558_v43 = vadd.f32 %v547_v36, %v442_v39  ;;  %v579_v44 = vsel %vm575_vm1, %v1125_v37, 0.0 }
  0xea   : > { %580 = vadd.xlane.f32.xlu0 %v579_v44  ;;  %v589_v45 = vmul.f32 %v1125_v37, %v1125_v37 }
  0xeb   : > { %v569_v46 = vadd.f32 %v794_v25, %v558_v43  ;;  %v1133_v47 = vmax.f32 %v570_v42, 0.0  ;;  %v576_v50 = vsel %vm575_vm1, %v1127_v41, 0.0  ;;  %v588_v51 = vmul.f32 %v1127_v41, %v1127_v41 }
  0xec   : > { %v595_v48 = vsel %vm575_vm1, %v589_v45, 0.0 }
  0xed   : > { %v1136_v49 = vmax.f32 %v569_v46, 0.0  ;;  %596 = vadd.xlane.f32.xlu1 %v595_v48  ;;  %v585_v52 = vsel %vm575_vm1, %v1133_v47, 0.0  ;;  %v592_v53 = vsel %vm575_vm1, %v588_v51, 0.0  ;;  %v591_v56 = vmul.f32 %v1133_v47, %v1133_v47 }
  0xee   : > { %577 = vadd.xlane.f32.xlu0 %v576_v50 }
  0xef   : > { %v590_v54 = vmul.f32 %v1136_v49, %v1136_v49  ;;  %v582_v55 = vsel %vm575_vm1, %v1136_v49, 0.0  ;;  %v601_v58 = vsel %vm575_vm1, %v591_v56, 0.0 }
  0xf1   : > { %586 = vadd.xlane.f32.xlu1 %v585_v52  ;;  %v598_v57 = vsel %vm575_vm1, %v590_v54, 0.0 }
  0xf2   : > { %593 = vadd.xlane.f32.xlu0 %v592_v53 }
  0xf5   : > { %583 = vadd.xlane.f32.xlu1 %v582_v55 }
  0xf6   : > { %599 = vadd.xlane.f32.xlu0 %v598_v57 }
  0xf9   : > { %602 = vadd.xlane.f32.xlu1 %v601_v58 }
 0x173   : > { %v581_v59 = vpop.xlane.xlu0 %580 }
 0x174   : > { %v605_v60 = vmul.f32 0.03125, %v581_v59 }
 0x176   : > { %v613_v61 = vmul.f32 %v605_v60, %v605_v60  ;;  %v597_v62 = vpop.xlane.xlu1 %596  ;;  %v625_v27 = vsub.f32 %v1125_v37, %v605_v60 }
 0x177   : > { %v609_v63 = vmul.f32 0.03125, %v597_v62  ;;  %v578_v0 = vpop.xlane.xlu0 %577 }
 0x178   : > { %v604_v1 = vmul.f32 0.03125, %v578_v0 }
 0x179   : > { %v617_v2 = vsub.f32 %v609_v63, %v613_v61 }
 0x17a   : > { %v587_v3 = vpop.xlane.xlu1 %586  ;;  %v612_v6 = vmul.f32 %v604_v1, %v604_v1  ;;  %v624_v33 = vsub.f32 %v1127_v41, %v604_v1 }
 0x17b   : > { %v621_v4 = vmax.f32 %v617_v2, 0.0  ;;  %v594_v5 = vpop.xlane.xlu0 %593  ;;  %v607_v11 = vmul.f32 0.03125, %v587_v3 }
 0x17c   : > { %v608_v7 = vmul.f32 0.03125, %v594_v5 }
 0x17d   : > { %v629_v8 = vadd.f32 1e-05, %v621_v4  ;;  %v615_v19 = vmul.f32 %v607_v11, %v607_v11  ;;  %v627_v42 = vsub.f32 %v1133_v47, %v607_v11 }
 0x17e   : > { %v616_v9 = vsub.f32 %v608_v7, %v612_v6  ;;  %v584_v10 = vpop.xlane.xlu1 %583 }
 0x17f   : > { %913 = vrsqrt.f32 %v629_v8  ;;  %v606_v12 = vmul.f32 0.03125, %v584_v10  ;;  %v600_v13 = vpop.xlane.xlu0 %599 }
 0x180   : > { %v620_v14 = vmax.f32 %v616_v9, 0.0  ;;  %v610_v15 = vmul.f32 0.03125, %v600_v13 }
 0x181   : > { %v614_v16 = vmul.f32 %v606_v12, %v606_v12  ;;  %v626_v38 = vsub.f32 %v1136_v49, %v606_v12 }
 0x182   : > { %v628_v17 = vadd.f32 1e-05, %v620_v14  ;;  %v603_v18 = vpop.xlane.xlu1 %602 }
 0x183   : > { %v618_v20 = vsub.f32 %v610_v15, %v614_v16  ;;  %v611_v21 = vmul.f32 0.03125, %v603_v18 }
 0x184   : > { %915 = vrsqrt.f32 %v628_v17 }
 0x185   : > { %v622_v22 = vmax.f32 %v618_v20, 0.0  ;;  %v619_v23 = vsub.f32 %v611_v21, %v615_v19 }
 0x187   : > { %v630_v24 = vadd.f32 1e-05, %v622_v22  ;;  %v623_v25 = vmax.f32 %v619_v23, 0.0 }
 0x189   : > { %917 = vrsqrt.f32 %v630_v24  ;;  %v631_v26 = vadd.f32 1e-05, %v623_v25 }
 0x18b   : > { %919 = vrsqrt.f32 %v631_v26 }
 0x18c   : > { %v914_v28 = vpop.eup %913 }
 0x18d   : > { %v637_v30 = vmul.f32 %v914_v28, %v625_v27 }
 0x18f   : > { %v648_v32 = vmul.f32 %v795_v29, %v637_v30 }
 0x191   : > { %v916_v34 = vpop.eup %915  ;;  %v659_v35 = vadd.f32 %v796_v31, %v648_v32 }
 0x192   : > { %v636_v36 = vmul.f32 %v916_v34, %v624_v33 }
 0x193   : > { %663 = vst.msk [vmem:[%s231_s17 + $0x8] sm:$0xff] %vm575_vm1, %v659_v35 }
 0x194   : > { %v647_v37 = vmul.f32 %v795_v29, %v636_v36 }
 0x196   : > { %v918_v39 = vpop.eup %917  ;;  %v658_v40 = vadd.f32 %v796_v31, %v647_v37 }
 0x197   : > { %v638_v43 = vmul.f32 %v918_v39, %v626_v38 }
 0x198   : > { %v920_v44 = vpop.eup %919  ;;  %662 = vst.msk [vmem:[%s231_s17] sm:$0xff] %vm575_vm1, %v658_v40 }
 0x199   : > { %v649_v41 = vmul.f32 %v795_v29, %v638_v43  ;;  %v639_v45 = vmul.f32 %v920_v44, %v627_v42 }
 0x19b   : > { %v660_v46 = vadd.f32 %v796_v31, %v649_v41  ;;  %v650_v48 = vmul.f32 %v795_v29, %v639_v45 }
 0x19d   : > { %v661_v47 = vadd.f32 %v796_v31, %v650_v48  ;;  %664 = vst.msk [vmem:[%s231_s17 + $0x10] sm:$0xff] %vm575_vm1, %v660_v46 }
 0x19f   : > { %665 = vst.msk [vmem:[%s231_s17 + $0x18] sm:$0xff] %vm575_vm1, %v661_v47 }
 0x1a0   : > { %934 = shalt.err (!%p931_p5)
}
 0x1a1   : > { %s935_s11 = scalar_lea.hbm %s1172_s7, 512  ;;  %s939_s15 = scalar_lea.hbm %s1230_s5, 1024 }
 0x1a2   : > { %p936_p6 = scmp.ne.s32.totalorder %s1172_s7, %s935_s11  ;;  %p940_p10 = scmp.lt.s32.totalorder %s1172_s7, %s1230_s5 }
 0x1a3   : > { %p941_p11 = scmp.lt.s32.totalorder %s939_s15, %s935_s11 }
 0x1a4   : > { %p937_p7 = pnand %p936_p6, %p1072_p4 }
 0x1a5   : > { %p942_p12 = por %p941_p11, %p940_p10 }
 0x1a6   : > { %p938_p9 = pneg %p937_p7 }
 0x1a8   : > { %p943_p13 = pnand %p942_p12, %p938_p9 }
 0x1aa   : > { %946 = shalt.err (!%p943_p13)
}
 0x1ab   : > { %s1000_s24 = smov 128   ;;  %s1001_s27 = smov 8  }
 0x1ac   : > { %856 = dma.vmem_to_hbm [thread:$0]  (%p1072_p4), %s1174_s25, 512, %s1172_s7, %s1180_s21, %s1000_s24, %s1000_s24, %s1001_s27  }
 0x1ad PF: > { %p862_p0 = scmp.ge.s32.totalorder %s997_s23, 2  ;;  %s697_s29 = sand.u32 1, %s977_s18  }
 0x1ae   : > { %s698_s8 = scalar_lea.sflag [#allocation3], %s697_s29 }
 0x1af   : > { %p859_p1 = pnand %p862_p0, %p1079_p8 }
 0x1b1   : > { %p860_p2 = pneg %p859_p1 }
 0x1b3   : > { %972 = dma.done.wait (%p860_p2), %s698_s8, 512  }
 0x1b4   : > { %974 = vsyncadd (%p860_p2), %s698_s8, 4294966784  ;;  %s18_s23 = sadd.s32 1, %s997_s23   ;;  %s1233_s18 = smov %s981_s19 }
 0x1b5   : > { %p15_p3 = scmp.ge.s32.totalorder %s18_s23, 4   ;;  %s1234_s19 = smov %s985_s20 }
 0x1b6   : > { %s1235_s20 = smov %s1085_s6  ;;  %s1236_s21 = smov %s993_s22 }
 0x1b7   : > { %s1237_s22 = smov %s1239_s26  ;;  %17 = sbr.rel (!%p15_p3) target bundleno = 4 (0x4), region = 80 }
 0x1bc   :  { %703 = vsyncpa [#allocation3], 1 }
 0x1bd   :  { %705 = vsyncpa [#allocation3 + $0x1], 1 }

</bundles_post_ra>
